<compile_context>
chip_gen: v7x
topology: tpu7x:2x2x1
jax: 0.10.0
libtpu: 0.0.40
codegen_flags: <defaults>
</compile_context>

<pallas_src>
import functools

import jax
import jax.numpy as jnp
from jax.experimental import pallas as pl
from jax.experimental.pallas import tpu as pltpu


def _round_up(x, m):
    return ((x + m - 1) // m) * m


def actor_mlp_kernel(x_ref, w1_ref, b1_ref, w2_ref, b2_ref, w3_ref, b3_ref, o_ref):
    """Fused 3-layer MLP: bf16 MXU inputs, f32 accumulation + elementwise."""
    bf = lambda t: t.astype(jnp.bfloat16)
    # Hidden layer 1: ReLU(x @ W1 + b1)
    h = jnp.dot(bf(x_ref[...]), bf(w1_ref[...]), preferred_element_type=jnp.float32)
    h = jnp.maximum(h + b1_ref[...], 0.0)
    # Hidden layer 2: ReLU(h @ W2 + b2)
    h = jnp.dot(bf(h), bf(w2_ref[...]), preferred_element_type=jnp.float32)
    h = jnp.maximum(h + b2_ref[...], 0.0)
    # Output layer: Tanh(h @ W3 + b3)
    y = jnp.dot(bf(h), bf(w3_ref[...]), preferred_element_type=jnp.float32)
    o_ref[...] = jnp.tanh(y + b3_ref[...])


@functools.partial(jax.jit, static_argnames=("tb",))
def actor_forward(obs, params, *, tb=None):
    """Fused MLP forward pass (single pallas_call, batch-tiled 1-D grid)."""
    (w1, b1), (w2, b2), (w3, b3) = params
    B, obs_dim = obs.shape
    h1, h2, act_dim = w1.shape[1], w2.shape[1], w3.shape[1]

    # Batch tile: big tiles for replay-buffer batches, clamped for small B.
    if tb is None:
        tb = min(512, _round_up(B, 8))
    tb = max(8, _round_up(tb, 8))
    b_pad = _round_up(max(B, tb), tb)
    grid = (b_pad // tb,)

    x = obs
    if b_pad != B:
        # Only wrapper-side data movement left; zero rows are sliced off below.
        x = jnp.pad(x, ((0, b_pad - B), (0, 0)))

    # Weights/biases: full-extent blocks with constant index_maps -> DMA'd once
    # and kept resident in VMEM across all batch tiles.
    resident = lambda shape: pl.BlockSpec(shape, lambda i: (0, 0))

    out = pl.pallas_call(
        actor_mlp_kernel,
        out_shape=jax.ShapeDtypeStruct((b_pad, act_dim), jnp.float32),
        grid=grid,
        in_specs=[
            pl.BlockSpec((tb, obs_dim), lambda i: (i, 0)),  # obs tile, batch-pipelined
            resident((obs_dim, h1)), resident((1, h1)),
            resident((h1, h2)), resident((1, h2)),
            resident((h2, act_dim)), resident((1, act_dim)),
        ],
        out_specs=pl.BlockSpec((tb, act_dim), lambda i: (i, 0)),
        compiler_params=pltpu.CompilerParams(
            dimension_semantics=("parallel",),
        ),
    )(x, w1, b1, w2, b2, w3, b3)

    if b_pad != B:
        out = out[:B]
    return out


def init_actor_params(key, obs_dim, act_dim, hidden_sizes):
    """Deterministic synthetic parameters (weights stored as (in, out))."""
    sizes = [obs_dim] + list(hidden_sizes) + [act_dim]
    params = []
    for j in range(len(sizes) - 1):
        key, wk, bk = jax.random.split(key, 3)
        bound = 1.0 / jnp.sqrt(sizes[j])  # mimic torch.nn.Linear default init range
        w = jax.random.uniform(wk, (sizes[j], sizes[j + 1]), jnp.float32, -bound, bound)
        b = jax.random.uniform(bk, (1, sizes[j + 1]), jnp.float32, -bound, bound)
        params.append((w, b))
    return params


def actor_forward_ref_f32(obs, params):
    """Pure-f32 JAX reference (matches the PyTorch module exactly)."""
    (w1, b1), (w2, b2), (w3, b3) = params
    h = jnp.maximum(obs @ w1 + b1, 0.0)
    h = jnp.maximum(h @ w2 + b2, 0.0)
    return jnp.tanh(h @ w3 + b3)


def actor_forward_ref_bf16(obs, params):
    """Reference mimicking the kernel's bf16-input / f32-accum numerics."""
    bf = lambda t: t.astype(jnp.bfloat16)
    (w1, b1), (w2, b2), (w3, b3) = params
    h = jnp.maximum(jnp.dot(bf(obs), bf(w1), preferred_element_type=jnp.float32) + b1, 0.0)
    h = jnp.maximum(jnp.dot(bf(h), bf(w2), preferred_element_type=jnp.float32) + b2, 0.0)
    return jnp.tanh(jnp.dot(bf(h), bf(w3), preferred_element_type=jnp.float32) + b3)


if __name__ == "__main__":
    obs_dim, act_dim = 16, 8
    hidden_sizes = [32, 32]
    batch = 256
    tb = 64  # small tile just to exercise the 4-step batch grid; use >=256 for real batches

    key = jax.random.PRNGKey(0)
    key, obs_key = jax.random.split(key)
    obs = jax.random.normal(obs_key, (batch, obs_dim), jnp.float32)
    params = init_actor_params(key, obs_dim, act_dim, hidden_sizes)

    out = actor_forward(obs, params, tb=tb)
    out = jax.block_until_ready(out)

    assert out.shape == (batch, act_dim)
    ref_bf16 = actor_forward_ref_bf16(obs, params)
    ref_f32 = actor_forward_ref_f32(obs, params)
    assert jnp.allclose(out, ref_bf16, atol=1e-2, rtol=1e-2), "mismatch vs bf16 reference"
    assert jnp.allclose(out, ref_f32, atol=5e-2, rtol=5e-2), "mismatch vs f32 reference"

    # Also exercise the non-divisible-batch path once (wrapper pad + slice).
    out_ragged = jax.block_until_ready(actor_forward(obs[:100], params, tb=tb))
    assert out_ragged.shape == (100, act_dim)
    assert jnp.allclose(out_ragged, ref_f32[:100], atol=5e-2, rtol=5e-2)

    print("KERNEL_OK")
</pallas_src>

<mosaic_0001>
module attributes {stable_mosaic.version = 11 : i64} {
  func.func @actor_mlp_kernel(%arg0: i32, %arg1: memref<64x16xf32, #tpu.memory_space<vmem>>, %arg2: memref<16x32xf32, #tpu.memory_space<vmem>>, %arg3: memref<1x32xf32, #tpu.memory_space<vmem>>, %arg4: memref<32x32xf32, #tpu.memory_space<vmem>>, %arg5: memref<1x32xf32, #tpu.memory_space<vmem>>, %arg6: memref<32x8xf32, #tpu.memory_space<vmem>>, %arg7: memref<1x8xf32, #tpu.memory_space<vmem>>, %arg8: memref<64x8xf32, #tpu.memory_space<vmem>>) attributes {dimension_semantics = [#tpu.dimension_semantics<parallel>], iteration_bounds = array<i64: 4>, scalar_prefetch = 0 : i64, scratch_operands = 0 : i64, tpu.core_type = #tpu.core_type<tc>, window_params = [{transform_indices = @transform_0, window_bounds = array<i64: 64, 16>}, {pipeline_mode = #tpu.pipeline_mode<synchronous>, transform_indices = @transform_1, window_bounds = array<i64: 16, 32>}, {pipeline_mode = #tpu.pipeline_mode<synchronous>, transform_indices = @transform_2, window_bounds = array<i64: 1, 32>}, {pipeline_mode = #tpu.pipeline_mode<synchronous>, transform_indices = @transform_3, window_bounds = array<i64: 32, 32>}, {pipeline_mode = #tpu.pipeline_mode<synchronous>, transform_indices = @transform_4, window_bounds = array<i64: 1, 32>}, {pipeline_mode = #tpu.pipeline_mode<synchronous>, transform_indices = @transform_5, window_bounds = array<i64: 32, 8>}, {pipeline_mode = #tpu.pipeline_mode<synchronous>, transform_indices = @transform_6, window_bounds = array<i64: 1, 8>}, {transform_indices = @transform_7, window_bounds = array<i64: 64, 8>}]} {
    %c0 = arith.constant 0 : index
    %c0_0 = arith.constant 0 : index
    %0 = vector.load %arg1[%c0, %c0_0] : memref<64x16xf32, #tpu.memory_space<vmem>>, vector<64x16xf32>
    %1 = arith.truncf %0 : vector<64x16xf32> to vector<64x16xbf16>
    %c0_1 = arith.constant 0 : index
    %c0_2 = arith.constant 0 : index
    %2 = vector.load %arg2[%c0_1, %c0_2] : memref<16x32xf32, #tpu.memory_space<vmem>>, vector<16x32xf32>
    %3 = arith.truncf %2 : vector<16x32xf32> to vector<16x32xbf16>
    %cst = arith.constant dense<0.000000e+00> : vector<64x32xf32>
    %4 = tpu.matmul %1, %3, %cst {dimension_numbers = #tpu.dot_dimension_numbers<[1], [0], [0], [1], [0, 0, 1, 1], [], []>} : vector<64x16xbf16>, vector<16x32xbf16>, vector<64x32xf32> -> vector<64x32xf32>
    %c0_3 = arith.constant 0 : index
    %c0_4 = arith.constant 0 : index
    %5 = vector.load %arg3[%c0_3, %c0_4] : memref<1x32xf32, #tpu.memory_space<vmem>>, vector<1x32xf32>
    %6 = vector.broadcast %5 : vector<1x32xf32> to vector<64x32xf32>
    %7 = arith.addf %4, %6 : vector<64x32xf32>
    %cst_5 = arith.constant 0.000000e+00 : f32
    %8 = vector.broadcast %cst_5 : f32 to vector<64x32xf32>
    %9 = arith.maximumf %7, %8 : vector<64x32xf32>
    %10 = arith.truncf %9 : vector<64x32xf32> to vector<64x32xbf16>
    %c0_6 = arith.constant 0 : index
    %c0_7 = arith.constant 0 : index
    %11 = vector.load %arg4[%c0_6, %c0_7] : memref<32x32xf32, #tpu.memory_space<vmem>>, vector<32x32xf32>
    %12 = arith.truncf %11 : vector<32x32xf32> to vector<32x32xbf16>
    %cst_8 = arith.constant dense<0.000000e+00> : vector<64x32xf32>
    %13 = tpu.matmul %10, %12, %cst_8 {dimension_numbers = #tpu.dot_dimension_numbers<[1], [0], [0], [1], [0, 0, 1, 1], [], []>} : vector<64x32xbf16>, vector<32x32xbf16>, vector<64x32xf32> -> vector<64x32xf32>
    %c0_9 = arith.constant 0 : index
    %c0_10 = arith.constant 0 : index
    %14 = vector.load %arg5[%c0_9, %c0_10] : memref<1x32xf32, #tpu.memory_space<vmem>>, vector<1x32xf32>
    %15 = vector.broadcast %14 : vector<1x32xf32> to vector<64x32xf32>
    %16 = arith.addf %13, %15 : vector<64x32xf32>
    %cst_11 = arith.constant 0.000000e+00 : f32
    %17 = vector.broadcast %cst_11 : f32 to vector<64x32xf32>
    %18 = arith.maximumf %16, %17 : vector<64x32xf32>
    %19 = arith.truncf %18 : vector<64x32xf32> to vector<64x32xbf16>
    %c0_12 = arith.constant 0 : index
    %c0_13 = arith.constant 0 : index
    %20 = vector.load %arg6[%c0_12, %c0_13] : memref<32x8xf32, #tpu.memory_space<vmem>>, vector<32x8xf32>
    %21 = arith.truncf %20 : vector<32x8xf32> to vector<32x8xbf16>
    %cst_14 = arith.constant dense<0.000000e+00> : vector<64x8xf32>
    %22 = tpu.matmul %19, %21, %cst_14 {dimension_numbers = #tpu.dot_dimension_numbers<[1], [0], [0], [1], [0, 0, 1, 1], [], []>} : vector<64x32xbf16>, vector<32x8xbf16>, vector<64x8xf32> -> vector<64x8xf32>
    %c0_15 = arith.constant 0 : index
    %c0_16 = arith.constant 0 : index
    %23 = vector.load %arg7[%c0_15, %c0_16] : memref<1x8xf32, #tpu.memory_space<vmem>>, vector<1x8xf32>
    %24 = vector.broadcast %23 : vector<1x8xf32> to vector<64x8xf32>
    %25 = arith.addf %22, %24 : vector<64x8xf32>
    %26 = math.tanh %25 : vector<64x8xf32>
    %c0_17 = arith.constant 0 : index
    %c0_18 = arith.constant 0 : index
    %27 = vector.load %arg8[%c0_17, %c0_18] : memref<64x8xf32, #tpu.memory_space<vmem>>, vector<64x8xf32>
    tpu.vector_store %arg8[%c0_17, %c0_18], %26 {strides = array<i32>} : memref<64x8xf32, #tpu.memory_space<vmem>>, vector<64x8xf32>,
    return
  }
  func.func @transform_0(%arg0: i32) -> (i32, i32) {
    %c0_i32 = arith.constant 0 : i32
    %c0_i32_0 = arith.constant 0 : i32
    return %arg0, %c0_i32 : i32, i32
  }
  func.func @transform_1(%arg0: i32) -> (i32, i32) {
    %c0_i32 = arith.constant 0 : i32
    %c0_i32_0 = arith.constant 0 : i32
    %c0_i32_1 = arith.constant 0 : i32
    return %c0_i32, %c0_i32_0 : i32, i32
  }
  func.func @transform_2(%arg0: i32) -> (i32, i32) {
    %c0_i32 = arith.constant 0 : i32
    %c0_i32_0 = arith.constant 0 : i32
    %c0_i32_1 = arith.constant 0 : i32
    return %c0_i32, %c0_i32_0 : i32, i32
  }
  func.func @transform_3(%arg0: i32) -> (i32, i32) {
    %c0_i32 = arith.constant 0 : i32
    %c0_i32_0 = arith.constant 0 : i32
    %c0_i32_1 = arith.constant 0 : i32
    return %c0_i32, %c0_i32_0 : i32, i32
  }
  func.func @transform_4(%arg0: i32) -> (i32, i32) {
    %c0_i32 = arith.constant 0 : i32
    %c0_i32_0 = arith.constant 0 : i32
    %c0_i32_1 = arith.constant 0 : i32
    return %c0_i32, %c0_i32_0 : i32, i32
  }
  func.func @transform_5(%arg0: i32) -> (i32, i32) {
    %c0_i32 = arith.constant 0 : i32
    %c0_i32_0 = arith.constant 0 : i32
    %c0_i32_1 = arith.constant 0 : i32
    return %c0_i32, %c0_i32_0 : i32, i32
  }
  func.func @transform_6(%arg0: i32) -> (i32, i32) {
    %c0_i32 = arith.constant 0 : i32
    %c0_i32_0 = arith.constant 0 : i32
    %c0_i32_1 = arith.constant 0 : i32
    return %c0_i32, %c0_i32_0 : i32, i32
  }
  func.func @transform_7(%arg0: i32) -> (i32, i32) {
    %c0_i32 = arith.constant 0 : i32
    %c0_i32_0 = arith.constant 0 : i32
    return %arg0, %c0_i32 : i32, i32
  }
}

</mosaic_0001>

<bundles_post_ra>
// kernel: actor_forward.1
= control target key start
LH: loop header
LB: loop body
LE: loop exit
PB: predicated region body
PF: predicated region fallthrough
CT: control target
= control target key end

     0   :  { %s812_s24 = smov 0   ;;  %s891_s0 = inlined_call_operand.vmem [shape: f32[256,16], index: 0, kind: input, shape index: {}]   ;;  %s892_s1 = inlined_call_operand.vmem [shape: f32[16,32], index: 1, kind: input, shape index: {}]   ;;  %s893_s2 = inlined_call_operand.vmem [shape: f32[1,32], index: 2, kind: input, shape index: {}]   ;;  %s894_s3 = inlined_call_operand.vmem [shape: f32[32,32], index: 3, kind: input, shape index: {}]   ;;  %s895_s4 = inlined_call_operand.vmem [shape: f32[1,32], index: 4, kind: input, shape index: {}]   ;;  %s896_s5 = inlined_call_operand.vmem [shape: f32[32,8], index: 5, kind: input, shape index: {}]   ;;  %s897_s6 = inlined_call_operand.vmem [shape: f32[1,8], index: 6, kind: input, shape index: {}]   ;;  %s898_s7 = inlined_call_operand.vmem [shape: f32[256,8], index: 7, kind: output, shape index: {}]  }
   0x1 LB: > { %s661_s25 = sadd.s32 4294967295, %s770_s24   ;;  %p665_p0 = scmp.ge.s32.totalorder %s770_s24, 1  ;;  %s770_s24 = sphi %s812_s24, %s17_s24  }
   0x2   : > { %p238_p1 = scmp.lt.s32.totalorder %s770_s24, 5 }
   0x4   : > { %p239_p2 = pnand %p665_p0, %p238_p1 }
   0x5   : > { %v295_v0 = vld [vmem:[%s892_s1] sm:$0xff] (!%p239_p2)  ;;  %v296_v1 = vld [vmem:[%s892_s1 + $0x8] sm:$0xff] (!%p239_p2)  ;;  %s666_s30 = sshll.u32 (!%p239_p2), %s661_s25, 3  ;;  %vm305_vm0 = vcmask (!%p239_p2), 130048   ;;  %v397_v18 = vld [vmem:[%s894_s3 + $0x10] sm:$0xff] (!%p239_p2)  ;;  %vm408_vm1 = vcmask (!%p239_p2), 261120  }
   0x6   : > { %242 = sbr.rel (%p239_p2) target bundleno = 701 (0x2bd), region = 48  ;;  %v297_v2 = vpack.c.bf16 (!%p239_p2), %v296_v1, %v295_v0  ;;  %p271_p3 = scmp.lt.s32.totalorder (!%p239_p2), %s666_s30, 31  ;;  %v395_v15 = vld [vmem:[%s894_s3] sm:$0xff] (!%p239_p2)  ;;  %v396_v16 = vld [vmem:[%s894_s3 + $0x8] sm:$0xff] (!%p239_p2)  ;;  %v398_v19 = vld [vmem:[%s894_s3 + $0x18] sm:$0xff] (!%p239_p2)  ;;  %vm596_vm2 = vcmask (!%p239_p2), 64512  }
   0x7   : > { %v399_v17 = vpack.c.bf16 (!%p239_p2), %v396_v16, %v395_v15  ;;  %v400_v20 = vpack.c.bf16 (!%p239_p2), %v398_v19, %v397_v18  ;;  %v670_v21 = vld [vmem:[%s893_s2] ss:$0 sm:$0xff] (!%p239_p2)  ;;  %v499_v51 = vld [vmem:[%s896_s5 + $0x8] sm:$0xff] (!%p239_p2)  ;;  %v500_v53 = vld [vmem:[%s896_s5 + $0x10] sm:$0xff] (!%p239_p2) }
   0x8   : > { %704 = vmatprep.subr.bf16.mxu0 (!%p239_p2), %v297_v2  ;;  %738 = vmatprep.subr.bf16.mxu1 (!%p239_p2), %v297_v2  ;;  %v498_v50 = vld [vmem:[%s896_s5] sm:$0xff] (!%p239_p2)  ;;  %v501_v54 = vld [vmem:[%s896_s5 + $0x18] sm:$0xff] (!%p239_p2) }
   0x9   : > { %705 = vmatpush3.bf16.msra.mxu0 (!%p239_p2), %v297_v2  ;;  %739 = vmatpush3.bf16.msra.mxu1 (!%p239_p2), %v297_v2  ;;  %v502_v52 = vpack.c.bf16 (!%p239_p2), %v499_v51, %v498_v50  ;;  %v503_v55 = vpack.c.bf16 (!%p239_p2), %v501_v54, %v500_v53  ;;  %v675_v56 = vld [vmem:[%s895_s4] ss:$0 sm:$0xff] (!%p239_p2) }
   0xa   : > { %714 = vmatprep.subr.bf16.mxu1 (!%p239_p2), %v399_v17 }
   0xb   : > { %726 = vmatprep.subr.bf16.mxu0 (!%p239_p2), %v502_v52 }
   0xd   : > { %s900_s30 = smov (!%p271_p3, %s666_s30), 31 }
   0xe   : > { %s667_s8 = sshll.u32 %s900_s30, 3 }
   0xf   : > { %s274_s11 = scalar_lea.vmem %s891_s0, %s667_s8  ;;  %s280_s16 = scalar_lea.vmem %s898_s7, %s667_s8 }
  0x10   : > { %v283_v3 = vld [vmem:[%s274_s11] sm:$0xff]  ;;  %v284_v4 = vld [vmem:[%s274_s11 + $0x8] sm:$0xff]  ;;  %v285_v5 = vld [vmem:[%s274_s11 + $0x10] sm:$0xff] }
  0x11   : > { %v291_v6 = vpack.c.bf16 %v284_v4, %v283_v3  ;;  %v286_v7 = vld [vmem:[%s274_s11 + $0x18] sm:$0xff]  ;;  %v287_v8 = vld [vmem:[%s274_s11 + $0x20] sm:$0xff]  ;;  %v288_v9 = vld [vmem:[%s274_s11 + $0x28] sm:$0xff] }
  0x12   : > { %v292_v10 = vpack.c.bf16 %v286_v7, %v285_v5  ;;  %v293_v11 = vpack.c.bf16 %v288_v9, %v287_v8  ;;  %v289_v12 = vld [vmem:[%s274_s11 + $0x30] sm:$0xff]  ;;  %v290_v13 = vld [vmem:[%s274_s11 + $0x38] sm:$0xff] }
  0x13   : > { %706 = vmatprep.mubr.msk.bf16.mxu0 %vm305_vm0, %v291_v6  ;;  %v294_v14 = vpack.c.bf16 %v290_v13, %v289_v12 }
  0x14   : > { %707 = vmatmul.mubr.msk.bf16.vlgmr.msra.gmra.mrb[0].mxu0 %vm305_vm0, %v292_v10  ;;  %710 = vmatprep.mubr.msk.bf16.mxu1 %vm305_vm0, %v293_v11 }
  0x15   : > { %711 = vmatmul.mubr.msk.bf16.vlgmr.msra.gmra.mrb[0].mxu1 %vm305_vm0, %v294_v14  ;;  %727 = vmatpush3.bf16.msra.mxu0 %v502_v52 }
  0x16   : > { %715 = vmatpush3.bf16.msra.mxu1 %v399_v17  ;;  %728 = vmatprep.subr.bf16.mxu0 %v503_v55 }
  0x17   : > { %716 = vmatprep.subr.bf16.mxu1 %v400_v20 }
  0x19   : > { %729 = vmatpush3.bf16.msra.mxu0 %v503_v55 }
  0x1a   : > { %717 = vmatpush3.bf16.msra.mxu1 %v400_v20 }
  0xe7   : > { %v708_v22 = vpop.f32.mrb[0].mxu0 }
  0xe8   : > { %v361_v23 = vadd.f32 %v708_v22, %v670_v21  ;;  %v352_v24 = vpop.f32.mrb[1].mxu0  ;;  %v712_v25 = vpop.f32.mrb[0].mxu1 }
  0xe9   : > { %v353_v26 = vadd.f32 %v670_v21, %v352_v24  ;;  %v709_v27 = vpop.f32.mrb[2].mxu0  ;;  %v377_v28 = vadd.f32 %v712_v25, %v670_v21  ;;  %v368_v29 = vpop.f32.mrb[1].mxu1 }
  0xea   : > { %v364_v30 = vadd.f32 %v709_v27, %v670_v21  ;;  %v355_v31 = vpop.f32.mrb[3].mxu0  ;;  %v369_v32 = vadd.f32 %v670_v21, %v368_v29  ;;  %v713_v33 = vpop.f32.mrb[2].mxu1  ;;  %v385_v38 = vmax.f32 %v361_v23, 0.0 }
  0xeb   : > { %v356_v34 = vadd.f32 %v670_v21, %v355_v31  ;;  %v389_v35 = vmax.f32 %v377_v28, 0.0  ;;  %v380_v36 = vadd.f32 %v713_v33, %v670_v21  ;;  %v371_v37 = vpop.f32.mrb[3].mxu1  ;;  %v383_v42 = vmax.f32 %v353_v26, 0.0 }
  0xec   : > { %v386_v39 = vmax.f32 %v364_v30, 0.0  ;;  %v387_v40 = vmax.f32 %v369_v32, 0.0  ;;  %v372_v41 = vadd.f32 %v670_v21, %v371_v37  ;;  %v680_v21 = vld [vmem:[%s897_s6] ss:$0 sm:$0xff] }
  0xed   : > { %v384_v43 = vmax.f32 %v356_v34, 0.0  ;;  %v390_v44 = vmax.f32 %v380_v36, 0.0 }
  0xee   : > { %v392_v45 = vpack.c.bf16 %v386_v39, %v385_v38  ;;  %v388_v46 = vmax.f32 %v372_v41, 0.0 }
  0xef   : > { %v391_v47 = vpack.c.bf16 %v384_v43, %v383_v42  ;;  %v394_v48 = vpack.c.bf16 %v390_v44, %v389_v35 }
  0xf0   : > { %v393_v49 = vpack.c.bf16 %v388_v46, %v387_v40 }
  0xf1   : > { %718 = vmatprep.mubr.msk.bf16.mxu1 %vm408_vm1, %v391_v47 }
  0xf2   : > { %719 = vmatmul.mubr.msk.bf16.vlgmr.msra.gmra.mrb[4].mxu1 %vm408_vm1, %v392_v45 }
  0xf3   : > { %722 = vmatprep.mubr.msk.bf16.mxu1 %vm408_vm1, %v393_v49 }
  0xfa   : > { %723 = vmatmul.mubr.msk.bf16.gmra.mrb[8].mxu1 %vm408_vm1, %v394_v48 }
 0x1c5   : > { %v720_v57 = vpop.f32.mrb[4].mxu1 }
 0x1c6   : > { %v464_v58 = vadd.f32 %v720_v57, %v675_v56  ;;  %v455_v59 = vpop.f32.mrb[5].mxu1 }
 0x1c7   : > { %v456_v60 = vadd.f32 %v675_v56, %v455_v59  ;;  %v721_v61 = vpop.f32.mrb[6].mxu1 }
 0x1c8   : > { %v467_v62 = vadd.f32 %v721_v61, %v675_v56  ;;  %v458_v63 = vpop.f32.mrb[7].mxu1  ;;  %v488_v1 = vmax.f32 %v464_v58, 0.0 }
 0x1c9   : > { %v459_v0 = vadd.f32 %v675_v56, %v458_v63  ;;  %v486_v3 = vmax.f32 %v456_v60, 0.0 }
 0x1ca   : > { %v489_v2 = vmax.f32 %v467_v62, 0.0 }
 0x1cb   : > { %v487_v4 = vmax.f32 %v459_v0, 0.0 }
 0x1cc   : > { %v495_v5 = vpack.c.bf16 %v489_v2, %v488_v1 }
 0x1cd   : > { %v494_v6 = vpack.c.bf16 %v487_v4, %v486_v3  ;;  %v724_v7 = vpop.f32.mrb[8].mxu1 }
 0x1ce   : > { %v480_v8 = vadd.f32 %v724_v7, %v675_v56  ;;  %v471_v9 = vpop.f32.mrb[9].mxu1 }
 0x1cf   : > { %v472_v10 = vadd.f32 %v675_v56, %v471_v9  ;;  %v725_v11 = vpop.f32.mrb[10].mxu1  ;;  %730 = vmatprep.mubr.msk.bf16.mxu0 %vm408_vm1, %v494_v6 }
 0x1d0   : > { %v483_v12 = vadd.f32 %v725_v11, %v675_v56  ;;  %v474_v13 = vpop.f32.mrb[11].mxu1  ;;  %731 = vmatmul.mubr.msk.bf16.vlgmr.msra.gmra.mrb[4].mxu0 %vm408_vm1, %v495_v5  ;;  %v492_v15 = vmax.f32 %v480_v8, 0.0 }
 0x1d1   : > { %v475_v14 = vadd.f32 %v675_v56, %v474_v13  ;;  %v490_v17 = vmax.f32 %v472_v10, 0.0 }
 0x1d2   : > { %v493_v16 = vmax.f32 %v483_v12, 0.0 }
 0x1d3   : > { %v491_v18 = vmax.f32 %v475_v14, 0.0 }
 0x1d4   : > { %v497_v19 = vpack.c.bf16 %v493_v16, %v492_v15 }
 0x1d5   : > { %v496_v20 = vpack.c.bf16 %v491_v18, %v490_v17 }
 0x1d7   : > { %734 = vmatprep.mubr.msk.bf16.mxu0 %vm408_vm1, %v496_v20 }
 0x1d8   : > { %735 = vmatmul.mubr.msk.bf16.gmra.mrb[8].mxu0 %vm408_vm1, %v497_v19 }
 0x2a3   : > { %v732_v22 = vpop.f32.mrb[4].mxu0 }
 0x2a4   : > { %v566_v23 = vadd.f32 %v732_v22, %v680_v21  ;;  %v557_v24 = vpop.f32.mrb[5].mxu0 }
 0x2a5   : > { %v558_v25 = vadd.f32 %v680_v21, %v557_v24  ;;  %v733_v26 = vpop.f32.mrb[6].mxu0 }
 0x2a6   : > { %748 = vtanh.f32 %v566_v23  ;;  %v569_v27 = vadd.f32 %v733_v26, %v680_v21  ;;  %v560_v28 = vpop.f32.mrb[7].mxu0 }
 0x2a7   : > { %750 = vtanh.f32 %v558_v25  ;;  %v561_v29 = vadd.f32 %v680_v21, %v560_v28 }
 0x2a8   : > { %752 = vtanh.f32 %v569_v27 }
 0x2a9   : > { %754 = vtanh.f32 %v561_v29 }
 0x2ab   : > { %v736_v30 = vpop.f32.mrb[8].mxu0 }
 0x2ac   : > { %v582_v31 = vadd.f32 %v736_v30, %v680_v21  ;;  %v573_v32 = vpop.f32.mrb[9].mxu0 }
 0x2ad   : > { %v574_v33 = vadd.f32 %v680_v21, %v573_v32  ;;  %v737_v34 = vpop.f32.mrb[10].mxu0 }
 0x2ae   : > { %756 = vtanh.f32 %v582_v31  ;;  %v585_v35 = vadd.f32 %v737_v34, %v680_v21  ;;  %v576_v36 = vpop.f32.mrb[11].mxu0 }
 0x2af   : > { %758 = vtanh.f32 %v574_v33  ;;  %v577_v37 = vadd.f32 %v680_v21, %v576_v36 }
 0x2b0   : > { %v749_v38 = vpop.eup %748  ;;  %760 = vtanh.f32 %v585_v35 }
 0x2b1   : > { %v751_v39 = vpop.eup %750  ;;  %599 = vst.msk [vmem:[%s280_s16 + $0x10] sm:$0xff] %vm596_vm2, %v749_v38  ;;  %762 = vtanh.f32 %v577_v37 }
 0x2b2   : > { %v753_v40 = vpop.eup %752  ;;  %597 = vst.msk [vmem:[%s280_s16] sm:$0xff] %vm596_vm2, %v751_v39 }
 0x2b3   : > { %v755_v41 = vpop.eup %754  ;;  %600 = vst.msk [vmem:[%s280_s16 + $0x18] sm:$0xff] %vm596_vm2, %v753_v40 }
 0x2b4   : > { %598 = vst.msk [vmem:[%s280_s16 + $0x8] sm:$0xff] %vm596_vm2, %v755_v41 }
 0x2b8   : > { %v757_v42 = vpop.eup %756 }
 0x2b9   : > { %v759_v43 = vpop.eup %758  ;;  %603 = vst.msk [vmem:[%s280_s16 + $0x30] sm:$0xff] %vm596_vm2, %v757_v42 }
 0x2ba   : > { %v761_v44 = vpop.eup %760  ;;  %601 = vst.msk [vmem:[%s280_s16 + $0x20] sm:$0xff] %vm596_vm2, %v759_v43 }
 0x2bb   : > { %v763_v45 = vpop.eup %762  ;;  %604 = vst.msk [vmem:[%s280_s16 + $0x38] sm:$0xff] %vm596_vm2, %v761_v44 }
 0x2bc   : > { %602 = vst.msk [vmem:[%s280_s16 + $0x28] sm:$0xff] %vm596_vm2, %v763_v45 }
 0x2bd PF: > { %s17_s24 = sadd.s32 1, %s770_s24  }
 0x2be   : > { %p14_p4 = scmp.ge.s32.totalorder %s17_s24, 6  }
 0x2c0   :  { %16 = sbr.rel (!%p14_p4) target bundleno = 1 (0x1), region = 78 }

</bundles_post_ra>
